<compile_context>
chip_gen: v7x
topology: tpu7x:2x2x1
jax: 0.10.0
libtpu: 0.0.40
codegen_flags: <defaults>
</compile_context>

<pallas_src>
import jax
import jax.numpy as jnp
from jax.experimental import pallas as pl
from jax.experimental.pallas import tpu as pltpu

INPUT_DIM = 28 * 28        # 784
HL1, HL2, HL3 = 100, 50, 20
H1_PAD = 128               # lane-aligned padding of the first hidden layer
OUTPUT_DIM = 10


def mlp_kernel(x_ref, w1_ref, b1_ref, w2_ref, b2_ref,
               w3_ref, b3_ref, w4_ref, b4_ref, o_ref):
    # Operand dtype for the MXU (f32 or bf16); accumulation is always f32.
    cd = w1_ref.dtype

    # hl_1 + ReLU   (bias add / ReLU in f32 -> v5e-safe)
    h = jnp.dot(x_ref[...], w1_ref[...], preferred_element_type=jnp.float32)
    h = jnp.maximum(h + b1_ref[...], 0.0)
    # hl_2 + ReLU
    h = jnp.dot(h.astype(cd), w2_ref[...], preferred_element_type=jnp.float32)
    h = jnp.maximum(h + b2_ref[...], 0.0)
    # hl_3 + ReLU
    h = jnp.dot(h.astype(cd), w3_ref[...], preferred_element_type=jnp.float32)
    h = jnp.maximum(h + b3_ref[...], 0.0)
    # output layer (no activation)
    logits = jnp.dot(h.astype(cd), w4_ref[...], preferred_element_type=jnp.float32)
    logits = logits + b4_ref[...]

    # log_softmax along dim=1 (numerically stable, f32)
    m = jnp.max(logits, axis=-1, keepdims=True)
    shifted = logits - m
    lse = jnp.log(jnp.sum(jnp.exp(shifted), axis=-1, keepdims=True))
    o_ref[...] = (shifted - lse).astype(o_ref.dtype)


def mlp_forward(x_nchw, params, *, tb=512, compute_dtype=jnp.float32):
    """x_nchw: (B, 1, 28, 28) float32.  Returns (B, 10) float32 log-probabilities.

    tb:            batch tile (rows per grid step); clamped to a multiple of 8.
    compute_dtype: dtype of x / weights fed to the MXU (f32 or bf16). Accumulation
                   and elementwise math stay f32 inside the kernel.
    """
    b = x_nchw.shape[0]
    x2d = x_nchw.reshape(b, INPUT_DIM).astype(compute_dtype)   # x.view(-1, 784)

    w1, b1, w2, b2, w3, b3, w4, b4 = params

    # Zero-pad HL1 100 -> 128 lanes (exact: ReLU(x@w1_pad + 0) has zeros in the
    # padded columns, and the padded rows of w2 are zero).
    pad1 = H1_PAD - HL1
    w1 = jnp.pad(w1, ((0, 0), (0, pad1)))
    b1 = jnp.pad(b1, ((0, 0), (0, pad1)))
    w2 = jnp.pad(w2, ((0, pad1), (0, 0)))

    weights = [w.astype(compute_dtype) for w in (w1, w2, w3, w4)]
    biases = [bb.astype(jnp.float32) for bb in (b1, b2, b3, b4)]  # bias add in f32

    # Batch tiling: tile must be a multiple of 8 (f32 sublane); pad batch to a
    # whole number of tiles and slice the output back afterwards.
    tb = max(8, min(int(tb), ((b + 7) // 8) * 8))
    tb = ((tb + 7) // 8) * 8
    b_pad = pl.cdiv(b, tb) * tb
    if b_pad != b:
        x2d = jnp.pad(x2d, ((0, b_pad - b), (0, 0)))

    grid = (b_pad // tb,)

    # Weights/biases: full block, constant index_map -> VMEM-resident, DMA'd once.
    def resident(arr):
        return pl.BlockSpec(arr.shape, lambda i: (0, 0))

    in_specs = [pl.BlockSpec((tb, INPUT_DIM), lambda i: (i, 0))]
    args = [x2d]
    for w, bb in zip(weights, biases):
        in_specs += [resident(w), resident(bb)]
        args += [w, bb]

    flops = 2 * b_pad * (INPUT_DIM * H1_PAD + H1_PAD * HL2 + HL2 * HL3 + HL3 * OUTPUT_DIM)
    bytes_accessed = (
        x2d.size * x2d.dtype.itemsize
        + sum(a.size * a.dtype.itemsize for a in args[1:])
        + b_pad * OUTPUT_DIM * 4
    )
    cost = pl.CostEstimate(flops=flops,
                           transcendentals=b_pad * OUTPUT_DIM,
                           bytes_accessed=bytes_accessed)

    out = pl.pallas_call(
        mlp_kernel,
        out_shape=jax.ShapeDtypeStruct((b_pad, OUTPUT_DIM), jnp.float32),
        grid=grid,
        in_specs=in_specs,
        out_specs=pl.BlockSpec((tb, OUTPUT_DIM), lambda i: (i, 0)),
        compiler_params=pltpu.CompilerParams(
            dimension_semantics=("parallel",)),   # shard batch tiles across TCs (v7x)
        cost_estimate=cost,
    )(*args)

    return out[:b]


def init_params(key):
    """Deterministic init. Weights stored (in_features, out_features)."""
    dims = [(INPUT_DIM, HL1), (HL1, HL2), (HL2, HL3), (HL3, OUTPUT_DIM)]
    params = []
    for i, (fan_in, fan_out) in enumerate(dims):
        kw, kb = jax.random.split(jax.random.fold_in(key, i))
        bound = 1.0 / jnp.sqrt(fan_in)  # nn.Linear default U(-1/sqrt(in), 1/sqrt(in))
        w = jax.random.uniform(kw, (fan_in, fan_out), jnp.float32, -bound, bound)
        bvec = jax.random.uniform(kb, (1, fan_out), jnp.float32, -bound, bound)
        params += [w, bvec]
    return tuple(params)


def reference_forward(x_nchw, params):
    """Pure-JAX f32 reference."""
    b = x_nchw.shape[0]
    h = x_nchw.reshape(b, INPUT_DIM)
    (w1, b1, w2, b2, w3, b3, w4, b4) = params
    h = jnp.maximum(h @ w1 + b1, 0.0)
    h = jnp.maximum(h @ w2 + b2, 0.0)
    h = jnp.maximum(h @ w3 + b3, 0.0)
    logits = h @ w4 + b4
    return jax.nn.log_softmax(logits, axis=1)


if __name__ == "__main__":
    key = jax.random.PRNGKey(0)
    kx, kp = jax.random.split(key)
    params = init_params(kp)

    # 1) small ragged batch (exercises batch padding + single-tile grid), f32
    x_small = jax.random.normal(kx, (10, 1, 28, 28), dtype=jnp.float32)
    out_small = jax.block_until_ready(mlp_forward(x_small, params))
    ref_small = reference_forward(x_small, params)
    assert out_small.shape == (10, OUTPUT_DIM)
    assert jnp.allclose(out_small, ref_small, atol=1e-5, rtol=1e-5)

    # 2) multi-tile grid (3 tiles of 64 rows, last one ragged), f32
    x_big = jax.random.normal(jax.random.fold_in(kx, 1), (130, 1, 28, 28),
                              dtype=jnp.float32)
    out_big = jax.block_until_ready(mlp_forward(x_big, params, tb=64))
    ref_big = reference_forward(x_big, params)
    assert out_big.shape == (130, OUTPUT_DIM)
    assert jnp.allclose(out_big, ref_big, atol=1e-5, rtol=1e-5)

    # 3) bf16 operand path (f32 accumulation / elementwise) -- loose tolerance
    out_bf16 = jax.block_until_ready(
        mlp_forward(x_big, params, tb=64, compute_dtype=jnp.bfloat16))
    assert out_bf16.shape == (130, OUTPUT_DIM)
    assert jnp.allclose(out_bf16, ref_big, atol=1e-1, rtol=1e-1)

    print("KERNEL_OK")
</pallas_src>

<mosaic_0001>
module attributes {stable_mosaic.version = 11 : i64} {
  func.func @mlp_kernel(%arg0: i32, %arg1: memref<16x784xf32, #tpu.memory_space<vmem>>, %arg2: memref<784x128xf32, #tpu.memory_space<vmem>>, %arg3: memref<1x128xf32, #tpu.memory_space<vmem>>, %arg4: memref<128x50xf32, #tpu.memory_space<vmem>>, %arg5: memref<1x50xf32, #tpu.memory_space<vmem>>, %arg6: memref<50x20xf32, #tpu.memory_space<vmem>>, %arg7: memref<1x20xf32, #tpu.memory_space<vmem>>, %arg8: memref<20x10xf32, #tpu.memory_space<vmem>>, %arg9: memref<1x10xf32, #tpu.memory_space<vmem>>, %arg10: memref<16x10xf32, #tpu.memory_space<vmem>>) attributes {dimension_semantics = [#tpu.dimension_semantics<parallel>], iteration_bounds = array<i64: 1>, scalar_prefetch = 0 : i64, scratch_operands = 0 : i64, tpu.core_type = #tpu.core_type<tc>, window_params = [{transform_indices = @transform_0, window_bounds = array<i64: 16, 784>}, {pipeline_mode = #tpu.pipeline_mode<synchronous>, transform_indices = @transform_1, window_bounds = array<i64: 784, 128>}, {pipeline_mode = #tpu.pipeline_mode<synchronous>, transform_indices = @transform_2, window_bounds = array<i64: 1, 128>}, {pipeline_mode = #tpu.pipeline_mode<synchronous>, transform_indices = @transform_3, window_bounds = array<i64: 128, 50>}, {pipeline_mode = #tpu.pipeline_mode<synchronous>, transform_indices = @transform_4, window_bounds = array<i64: 1, 50>}, {pipeline_mode = #tpu.pipeline_mode<synchronous>, transform_indices = @transform_5, window_bounds = array<i64: 50, 20>}, {pipeline_mode = #tpu.pipeline_mode<synchronous>, transform_indices = @transform_6, window_bounds = array<i64: 1, 20>}, {pipeline_mode = #tpu.pipeline_mode<synchronous>, transform_indices = @transform_7, window_bounds = array<i64: 20, 10>}, {pipeline_mode = #tpu.pipeline_mode<synchronous>, transform_indices = @transform_8, window_bounds = array<i64: 1, 10>}, {transform_indices = @transform_9, window_bounds = array<i64: 16, 10>}]} {
    %c0 = arith.constant 0 : index
    %c0_0 = arith.constant 0 : index
    %0 = vector.load %arg1[%c0, %c0_0] : memref<16x784xf32, #tpu.memory_space<vmem>>, vector<16x784xf32>
    %c0_1 = arith.constant 0 : index
    %c0_2 = arith.constant 0 : index
    %1 = vector.load %arg2[%c0_1, %c0_2] : memref<784x128xf32, #tpu.memory_space<vmem>>, vector<784x128xf32>
    %cst = arith.constant dense<0.000000e+00> : vector<16x128xf32>
    %2 = tpu.matmul %0, %1, %cst {dimension_numbers = #tpu.dot_dimension_numbers<[1], [0], [0], [1], [0, 0, 1, 1], [], []>} : vector<16x784xf32>, vector<784x128xf32>, vector<16x128xf32> -> vector<16x128xf32>
    %c0_3 = arith.constant 0 : index
    %c0_4 = arith.constant 0 : index
    %3 = vector.load %arg3[%c0_3, %c0_4] : memref<1x128xf32, #tpu.memory_space<vmem>>, vector<1x128xf32>
    %4 = vector.broadcast %3 : vector<1x128xf32> to vector<16x128xf32>
    %5 = arith.addf %2, %4 : vector<16x128xf32>
    %cst_5 = arith.constant 0.000000e+00 : f32
    %6 = vector.broadcast %cst_5 : f32 to vector<16x128xf32>
    %7 = arith.maximumf %5, %6 : vector<16x128xf32>
    %c0_6 = arith.constant 0 : index
    %c0_7 = arith.constant 0 : index
    %8 = vector.load %arg4[%c0_6, %c0_7] : memref<128x50xf32, #tpu.memory_space<vmem>>, vector<128x50xf32>
    %cst_8 = arith.constant dense<0.000000e+00> : vector<16x50xf32>
    %9 = tpu.matmul %7, %8, %cst_8 {dimension_numbers = #tpu.dot_dimension_numbers<[1], [0], [0], [1], [0, 0, 1, 1], [], []>} : vector<16x128xf32>, vector<128x50xf32>, vector<16x50xf32> -> vector<16x50xf32>
    %c0_9 = arith.constant 0 : index
    %c0_10 = arith.constant 0 : index
    %10 = vector.load %arg5[%c0_9, %c0_10] : memref<1x50xf32, #tpu.memory_space<vmem>>, vector<1x50xf32>
    %11 = vector.broadcast %10 : vector<1x50xf32> to vector<16x50xf32>
    %12 = arith.addf %9, %11 : vector<16x50xf32>
    %cst_11 = arith.constant 0.000000e+00 : f32
    %13 = vector.broadcast %cst_11 : f32 to vector<16x50xf32>
    %14 = arith.maximumf %12, %13 : vector<16x50xf32>
    %c0_12 = arith.constant 0 : index
    %c0_13 = arith.constant 0 : index
    %15 = vector.load %arg6[%c0_12, %c0_13] : memref<50x20xf32, #tpu.memory_space<vmem>>, vector<50x20xf32>
    %cst_14 = arith.constant dense<0.000000e+00> : vector<16x20xf32>
    %16 = tpu.matmul %14, %15, %cst_14 {dimension_numbers = #tpu.dot_dimension_numbers<[1], [0], [0], [1], [0, 0, 1, 1], [], []>} : vector<16x50xf32>, vector<50x20xf32>, vector<16x20xf32> -> vector<16x20xf32>
    %c0_15 = arith.constant 0 : index
    %c0_16 = arith.constant 0 : index
    %17 = vector.load %arg7[%c0_15, %c0_16] : memref<1x20xf32, #tpu.memory_space<vmem>>, vector<1x20xf32>
    %18 = vector.broadcast %17 : vector<1x20xf32> to vector<16x20xf32>
    %19 = arith.addf %16, %18 : vector<16x20xf32>
    %cst_17 = arith.constant 0.000000e+00 : f32
    %20 = vector.broadcast %cst_17 : f32 to vector<16x20xf32>
    %21 = arith.maximumf %19, %20 : vector<16x20xf32>
    %c0_18 = arith.constant 0 : index
    %c0_19 = arith.constant 0 : index
    %22 = vector.load %arg8[%c0_18, %c0_19] : memref<20x10xf32, #tpu.memory_space<vmem>>, vector<20x10xf32>
    %cst_20 = arith.constant dense<0.000000e+00> : vector<16x10xf32>
    %23 = tpu.matmul %21, %22, %cst_20 {dimension_numbers = #tpu.dot_dimension_numbers<[1], [0], [0], [1], [0, 0, 1, 1], [], []>} : vector<16x20xf32>, vector<20x10xf32>, vector<16x10xf32> -> vector<16x10xf32>
    %c0_21 = arith.constant 0 : index
    %c0_22 = arith.constant 0 : index
    %24 = vector.load %arg9[%c0_21, %c0_22] : memref<1x10xf32, #tpu.memory_space<vmem>>, vector<1x10xf32>
    %25 = vector.broadcast %24 : vector<1x10xf32> to vector<16x10xf32>
    %26 = arith.addf %23, %25 : vector<16x10xf32>
    %cst_23 = arith.constant dense<0xFF800000> : vector<16xf32>
    %27 = vector.multi_reduction <maximumf>, %26, %cst_23 [1] : vector<16x10xf32> to vector<16xf32>
    %28 = vector.shape_cast %27 : vector<16xf32> to vector<16x1xf32>
    %29 = vector.broadcast %28 : vector<16x1xf32> to vector<16x10xf32>
    %30 = arith.subf %26, %29 : vector<16x10xf32>
    %31 = math.exp %30 : vector<16x10xf32>
    %cst_24 = arith.constant dense<0.000000e+00> : vector<16xf32>
    %32 = vector.multi_reduction <add>, %31, %cst_24 [1] : vector<16x10xf32> to vector<16xf32>
    %33 = vector.shape_cast %32 : vector<16xf32> to vector<16x1xf32>
    %34 = math.log %33 : vector<16x1xf32>
    %35 = vector.broadcast %34 : vector<16x1xf32> to vector<16x10xf32>
    %36 = arith.subf %30, %35 : vector<16x10xf32>
    %c0_25 = arith.constant 0 : index
    %c0_26 = arith.constant 0 : index
    %37 = vector.load %arg10[%c0_25, %c0_26] : memref<16x10xf32, #tpu.memory_space<vmem>>, vector<16x10xf32>
    tpu.vector_store %arg10[%c0_25, %c0_26], %36 {strides = array<i32>} : memref<16x10xf32, #tpu.memory_space<vmem>>, vector<16x10xf32>,
    return
  }
  func.func @transform_0(%arg0: i32) -> (i32, i32) {
    %c0_i32 = arith.constant 0 : i32
    %c0_i32_0 = arith.constant 0 : i32
    return %arg0, %c0_i32 : i32, i32
  }
  func.func @transform_1(%arg0: i32) -> (i32, i32) {
    %c0_i32 = arith.constant 0 : i32
    %c0_i32_0 = arith.constant 0 : i32
    %c0_i32_1 = arith.constant 0 : i32
    return %c0_i32, %c0_i32_0 : i32, i32
  }
  func.func @transform_2(%arg0: i32) -> (i32, i32) {
    %c0_i32 = arith.constant 0 : i32
    %c0_i32_0 = arith.constant 0 : i32
    %c0_i32_1 = arith.constant 0 : i32
    return %c0_i32, %c0_i32_0 : i32, i32
  }
  func.func @transform_3(%arg0: i32) -> (i32, i32) {
    %c0_i32 = arith.constant 0 : i32
    %c0_i32_0 = arith.constant 0 : i32
    %c0_i32_1 = arith.constant 0 : i32
    return %c0_i32, %c0_i32_0 : i32, i32
  }
  func.func @transform_4(%arg0: i32) -> (i32, i32) {
    %c0_i32 = arith.constant 0 : i32
    %c0_i32_0 = arith.constant 0 : i32
    %c0_i32_1 = arith.constant 0 : i32
    return %c0_i32, %c0_i32_0 : i32, i32
  }
  func.func @transform_5(%arg0: i32) -> (i32, i32) {
    %c0_i32 = arith.constant 0 : i32
    %c0_i32_0 = arith.constant 0 : i32
    %c0_i32_1 = arith.constant 0 : i32
    return %c0_i32, %c0_i32_0 : i32, i32
  }
  func.func @transform_6(%arg0: i32) -> (i32, i32) {
    %c0_i32 = arith.constant 0 : i32
    %c0_i32_0 = arith.constant 0 : i32
    %c0_i32_1 = arith.constant 0 : i32
    return %c0_i32, %c0_i32_0 : i32, i32
  }
  func.func @transform_7(%arg0: i32) -> (i32, i32) {
    %c0_i32 = arith.constant 0 : i32
    %c0_i32_0 = arith.constant 0 : i32
    %c0_i32_1 = arith.constant 0 : i32
    return %c0_i32, %c0_i32_0 : i32, i32
  }
  func.func @transform_8(%arg0: i32) -> (i32, i32) {
    %c0_i32 = arith.constant 0 : i32
    %c0_i32_0 = arith.constant 0 : i32
    %c0_i32_1 = arith.constant 0 : i32
    return %c0_i32, %c0_i32_0 : i32, i32
  }
  func.func @transform_9(%arg0: i32) -> (i32, i32) {
    %c0_i32 = arith.constant 0 : i32
    %c0_i32_0 = arith.constant 0 : i32
    return %arg0, %c0_i32 : i32, i32
  }
}

</mosaic_0001>

<bundles_post_ra>
// kernel: tpu_custom_call.1
= control target key start
LH: loop header
LB: loop body
LE: loop exit
PB: predicated region body
PF: predicated region fallthrough
CT: control target
= control target key end

     0   :  { %14 = vsyncpa [#allocation3], 0  ;;  %s1477_s0 = inlined_call_operand.vmem [shape: f32[16,784], index: 0, kind: input, shape index: {}]   ;;  %s1478_s1 = inlined_call_operand.hbm [shape: f32[784,128], index: 1, kind: input, shape index: {}]   ;;  %s1479_s2 = inlined_call_operand.vmem [shape: f32[1,128], index: 2, kind: input, shape index: {}]   ;;  %s1480_s3 = inlined_call_operand.vmem [shape: f32[128,50], index: 3, kind: input, shape index: {}]   ;;  %s1481_s4 = inlined_call_operand.vmem [shape: f32[1,50], index: 4, kind: input, shape index: {}]   ;;  %s1482_s5 = inlined_call_operand.vmem [shape: f32[50,20], index: 5, kind: input, shape index: {}]   ;;  %s1483_s6 = inlined_call_operand.vmem [shape: f32[1,20], index: 6, kind: input, shape index: {}]   ;;  %s1484_s7 = inlined_call_operand.vmem [shape: f32[20,10], index: 7, kind: input, shape index: {}]   ;;  %s1485_s8 = inlined_call_operand.vmem [shape: f32[1,10], index: 8, kind: input, shape index: {}]   ;;  %s1486_s9 = inlined_call_operand.hbm [shape: f32[16,10], index: 9, kind: output, shape index: {}]  }
   0x1   :  { %15 = vsyncpa [#allocation4], 0  ;;  %s1255_s30 = smov [#allocation2]   ;;  %s1207_s13 = scalar_lea.hbm %s1478_s1, 12544 }
   0x2   :  { %s23_s10 = sshll.u32 %s1255_s30, 4  ;;  %p1208_p0 = scmp.ne.s32.totalorder %s1478_s1, %s1207_s13  ;;  %s24_s10 = int_to_ptr.vmem [resolvable:$true] %s23_s10 }
   0x3   :  { %p1211_p1 = scmp.lt.u32.totalorder %s1207_s13, %s1478_s1 }
   0x5   :  { %p1213_p2 = pnand %p1211_p1, %p1208_p0 }
   0x7   :  { %1216 = shalt.err (!%p1213_p2)
}
   0x8   :  { %s1217_s18 = scalar_lea.vmem %s24_s10, 12544  ;;  %p1222_p4 = scmp.lt.s32.totalorder %s24_s10, %s24_s10 }
   0x9   :  { %p1218_p3 = scmp.ne.s32.totalorder %s24_s10, %s1217_s18  ;;  %p1223_p5 = scmp.lt.s32.totalorder %s1217_s18, %s1217_s18 }
   0xb   :  { %p1224_p6 = por %p1223_p5, %p1222_p4 }
   0xd   :  { %p1225_p7 = pnand %p1224_p6, %p1218_p3 }
   0xf   :  { %1228 = shalt.err (!%p1225_p7)
}
  0x10   :  { %s1256_s19 = smov 128   ;;  %s1257_s20 = smov 8  }
  0x11   :  { %29 = dma.hbm_to_vmem [thread:$0]  %s1478_s1, 12544, %s24_s10, [#allocation3], %s1256_s19, %s1256_s19, %s1257_s20  }
  0x12   :  { %1251 = dma.done.wait [#allocation3], 12544  }
  0x13   :  { %1252 = vsyncadd [#allocation3], 4294954752  ;;  %v77_v0 = vld [vmem:[#allocation2 + $0x80] sm:$0xff]  ;;  %v78_v1 = vld [vmem:[#allocation2 + $0x88] sm:$0xff]  ;;  %vm166_vm0 = vcmask 130048   ;;  %vm596_vm1 = vcmask 1041408  }
  0x14   :  { %v61_v2 = vld [vmem:[#allocation2] sm:$0xff]  ;;  %v1047_v3 = vpack.c.bf16 %v78_v1, %v77_v0  ;;  %v62_v4 = vld [vmem:[#allocation2 + $0x8] sm:$0xff]  ;;  %v79_v11 = vld [vmem:[#allocation2 + $0x90] sm:$0xff]  ;;  %vm589_vm2 = vcmask 408576   ;;  %vm694_vm3 = vcmask 1043456   ;;  %vm687_vm4 = vcmask 162816  }
  0x15   :  { %v109_v5 = vld [vmem:[#allocation2 + $0x180] sm:$0xff]  ;;  %v110_v6 = vld [vmem:[#allocation2 + $0x188] sm:$0xff]  ;;  %v1049_v7 = vpack.c.bf16 %v62_v4, %v61_v2  ;;  %v80_v13 = vld [vmem:[#allocation2 + $0x98] sm:$0xff]  ;;  %vm773_vm5 = vcmask 80896  }
  0x16   :  { %v1079_v8 = vpack.c.bf16 %v110_v6, %v109_v5  ;;  %v93_v9 = vld [vmem:[#allocation2 + $0x100] sm:$0xff]  ;;  %v94_v10 = vld [vmem:[#allocation2 + $0x108] sm:$0xff]  ;;  %1048 = vmatprep.subr.bf16.mxu0 %v1047_v3  ;;  %v63_v14 = vld [vmem:[#allocation2 + $0x10] sm:$0xff]  ;;  %v1051_v16 = vpack.c.bf16 %v80_v13, %v79_v11 }
  0x17   :  { %v1081_v12 = vpack.c.bf16 %v94_v10, %v93_v9  ;;  %v64_v15 = vld [vmem:[#allocation2 + $0x18] sm:$0xff]  ;;  %1050 = vmatpush3.bf16.msra.mxu0 %v1049_v7  ;;  %v111_v18 = vld [vmem:[#allocation2 + $0x190] sm:$0xff]  ;;  %v81_v23 = vld [vmem:[#allocation2 + $0xa0] sm:$0xff] }
  0x18   :  { %1080 = vmatprep.subr.bf16.mxu1 %v1079_v8  ;;  %v1053_v17 = vpack.c.bf16 %v64_v15, %v63_v14  ;;  %v112_v19 = vld [vmem:[#allocation2 + $0x198] sm:$0xff]  ;;  %v95_v20 = vld [vmem:[#allocation2 + $0x110] sm:$0xff]  ;;  %v82_v24 = vld [vmem:[#allocation2 + $0xa8] sm:$0xff]  ;;  %1052 = vmatprep.subr.bf16.mxu0 %v1051_v16 }
  0x19   :  { %1082 = vmatpush3.bf16.msra.mxu1 %v1081_v12  ;;  %v1083_v21 = vpack.c.bf16 %v112_v19, %v111_v18  ;;  %v96_v22 = vld [vmem:[#allocation2 + $0x118] sm:$0xff]  ;;  %v1055_v26 = vpack.c.bf16 %v82_v24, %v81_v23  ;;  %v65_v27 = vld [vmem:[#allocation2 + $0x20] sm:$0xff]  ;;  %v66_v28 = vld [vmem:[#allocation2 + $0x28] sm:$0xff] }
  0x1a   :  { %v1085_v25 = vpack.c.bf16 %v96_v22, %v95_v20  ;;  %v113_v29 = vld [vmem:[#allocation2 + $0x1a0] sm:$0xff]  ;;  %v114_v30 = vld [vmem:[#allocation2 + $0x1a8] sm:$0xff]  ;;  %v1057_v33 = vpack.c.bf16 %v66_v28, %v65_v27  ;;  %v83_v35 = vld [vmem:[#allocation2 + $0xb0] sm:$0xff] }
  0x1b   :  { %1084 = vmatprep.subr.bf16.mxu1 %v1083_v21  ;;  %v97_v31 = vld [vmem:[#allocation2 + $0x120] sm:$0xff]  ;;  %v98_v32 = vld [vmem:[#allocation2 + $0x128] sm:$0xff]  ;;  %1054 = vmatpush3.bf16.msra.mxu0 %v1053_v17  ;;  %v1087_v34 = vpack.c.bf16 %v114_v30, %v113_v29  ;;  %v84_v36 = vld [vmem:[#allocation2 + $0xb8] sm:$0xff] }
  0x1c   :  { %v67_v37 = vld [vmem:[#allocation2 + $0x30] sm:$0xff]  ;;  %1056 = vmatprep.subr.bf16.mxu0 %v1055_v26  ;;  %v1089_v38 = vpack.c.bf16 %v98_v32, %v97_v31  ;;  %v1059_v39 = vpack.c.bf16 %v84_v36, %v83_v35  ;;  %v68_v40 = vld [vmem:[#allocation2 + $0x38] sm:$0xff]  ;;  %v85_v46 = vld [vmem:[#allocation2 + $0xc0] sm:$0xff] }
  0x1d   :  { %1086 = vmatpush3.bf16.msra.mxu1 %v1085_v25  ;;  %v115_v41 = vld [vmem:[#allocation2 + $0x1b0] sm:$0xff]  ;;  %v116_v42 = vld [vmem:[#allocation2 + $0x1b8] sm:$0xff]  ;;  %v86_v47 = vld [vmem:[#allocation2 + $0xc8] sm:$0xff]  ;;  %v1061_v48 = vpack.c.bf16 %v68_v40, %v67_v37 }
  0x1e   :  { %1088 = vmatprep.subr.bf16.mxu1 %v1087_v34  ;;  %v1091_v43 = vpack.c.bf16 %v116_v42, %v115_v41  ;;  %v99_v44 = vld [vmem:[#allocation2 + $0x130] sm:$0xff]  ;;  %v100_v45 = vld [vmem:[#allocation2 + $0x138] sm:$0xff]  ;;  %v117_v49 = vld [vmem:[#allocation2 + $0x1c0] sm:$0xff]  ;;  %v1063_v52 = vpack.c.bf16 %v86_v47, %v85_v46 }
  0x1f   :  { %1058 = vmatpush3.bf16.msra.mxu0 %v1057_v33  ;;  %v118_v50 = vld [vmem:[#allocation2 + $0x1c8] sm:$0xff]  ;;  %v1093_v51 = vpack.c.bf16 %v100_v45, %v99_v44  ;;  %v69_v53 = vld [vmem:[#allocation2 + $0x40] sm:$0xff]  ;;  %v87_v58 = vld [vmem:[#allocation2 + $0xd0] sm:$0xff] }
  0x20   :  { %1060 = vmatprep.subr.bf16.mxu0 %v1059_v39  ;;  %v70_v54 = vld [vmem:[#allocation2 + $0x48] sm:$0xff]  ;;  %v101_v55 = vld [vmem:[#allocation2 + $0x140] sm:$0xff]  ;;  %v1095_v56 = vpack.c.bf16 %v118_v50, %v117_v49  ;;  %v88_v59 = vld [vmem:[#allocation2 + $0xd8] sm:$0xff] }
  0x21   :  { %1090 = vmatpush3.bf16.msra.mxu1 %v1089_v38  ;;  %v102_v57 = vld [vmem:[#allocation2 + $0x148] sm:$0xff]  ;;  %v119_v60 = vld [vmem:[#allocation2 + $0x1d0] sm:$0xff]  ;;  %v120_v61 = vld [vmem:[#allocation2 + $0x1d8] sm:$0xff]  ;;  %v1065_v62 = vpack.c.bf16 %v70_v54, %v69_v53  ;;  %v1067_v0 = vpack.c.bf16 %v88_v59, %v87_v58 }
  0x22   :  { %1092 = vmatprep.subr.bf16.mxu1 %v1091_v43  ;;  %v1097_v63 = vpack.c.bf16 %v102_v57, %v101_v55  ;;  %v71_v1 = vld [vmem:[#allocation2 + $0x50] sm:$0xff]  ;;  %v72_v2 = vld [vmem:[#allocation2 + $0x58] sm:$0xff]  ;;  %v1099_v4 = vpack.c.bf16 %v120_v61, %v119_v60  ;;  %v89_v6 = vld [vmem:[#allocation2 + $0xe0] sm:$0xff] }
  0x23   :  { %1062 = vmatpush3.bf16.msra.mxu0 %v1061_v48  ;;  %v103_v3 = vld [vmem:[#allocation2 + $0x150] sm:$0xff]  ;;  %v104_v5 = vld [vmem:[#allocation2 + $0x158] sm:$0xff]  ;;  %v90_v7 = vld [vmem:[#allocation2 + $0xe8] sm:$0xff]  ;;  %v1069_v10 = vpack.c.bf16 %v72_v2, %v71_v1 }
  0x24   :  { %1064 = vmatprep.subr.bf16.mxu0 %v1063_v52  ;;  %v121_v8 = vld [vmem:[#allocation2 + $0x1e0] sm:$0xff]  ;;  %v122_v9 = vld [vmem:[#allocation2 + $0x1e8] sm:$0xff]  ;;  %v1101_v13 = vpack.c.bf16 %v104_v5, %v103_v3  ;;  %v1071_v14 = vpack.c.bf16 %v90_v7, %v89_v6  ;;  %v91_v19 = vld [vmem:[#allocation2 + $0xf0] sm:$0xff] }
  0x25   :  { %1094 = vmatpush3.bf16.msra.mxu1 %v1093_v51  ;;  %v73_v11 = vld [vmem:[#allocation2 + $0x60] sm:$0xff]  ;;  %v48_v12 = vld [vmem:[%s1477_s0 + $0x8] sm:$0xff]  ;;  %v1103_v18 = vpack.c.bf16 %v122_v9, %v121_v8  ;;  %v92_v20 = vld [vmem:[#allocation2 + $0xf8] sm:$0xff] }
  0x26   :  { %1096 = vmatprep.subr.bf16.mxu1 %v1095_v56  ;;  %v74_v15 = vld [vmem:[#allocation2 + $0x68] sm:$0xff]  ;;  %v105_v16 = vld [vmem:[#allocation2 + $0x160] sm:$0xff]  ;;  %237 = vmatprep.mubr.f32.mxu0 %v48_v12  ;;  %v50_v21 = vld [vmem:[%s1477_s0 + $0x18] sm:$0xff]  ;;  %v1075_v26 = vpack.c.bf16 %v92_v20, %v91_v19 }
  0x27   :  { %1066 = vmatpush3.bf16.msra.mxu0 %v1065_v62  ;;  %v106_v17 = vld [vmem:[#allocation2 + $0x168] sm:$0xff]  ;;  %v123_v22 = vld [vmem:[#allocation2 + $0x1f0] sm:$0xff]  ;;  %v124_v23 = vld [vmem:[#allocation2 + $0x1f8] sm:$0xff]  ;;  %312 = vmatprep.mubr.f32.mxu1 %v50_v21  ;;  %v1073_v24 = vpack.c.bf16 %v74_v15, %v73_v11 }
  0x28   :  { %1068 = vmatprep.subr.bf16.mxu0 %v1067_v0  ;;  %v1105_v25 = vpack.c.bf16 %v106_v17, %v105_v16  ;;  %v75_v27 = vld [vmem:[#allocation2 + $0x70] sm:$0xff]  ;;  %v76_v28 = vld [vmem:[#allocation2 + $0x78] sm:$0xff]  ;;  %v1107_v30 = vpack.c.bf16 %v124_v23, %v123_v22  ;;  %v141_v32 = vld [vmem:[#allocation2 + $0x280] sm:$0xff] }
  0x29   :  { %1098 = vmatpush3.bf16.msra.mxu1 %v1097_v63  ;;  %v107_v29 = vld [vmem:[#allocation2 + $0x170] sm:$0xff]  ;;  %v108_v31 = vld [vmem:[#allocation2 + $0x178] sm:$0xff]  ;;  %v142_v33 = vld [vmem:[#allocation2 + $0x288] sm:$0xff]  ;;  %v1077_v34 = vpack.c.bf16 %v76_v28, %v75_v27 }
  0x2a   :  { %1100 = vmatprep.subr.bf16.mxu1 %v1099_v4  ;;  %v1109_v35 = vpack.c.bf16 %v108_v31, %v107_v29  ;;  %v1111_v36 = vpack.c.bf16 %v142_v33, %v141_v32  ;;  %v125_v37 = vld [vmem:[#allocation2 + $0x200] sm:$0xff]  ;;  %v126_v38 = vld [vmem:[#allocation2 + $0x208] sm:$0xff]  ;;  %v143_v39 = vld [vmem:[#allocation2 + $0x290] sm:$0xff] }
  0x2b   :  { %1070 = vmatpush3.bf16.msra.mxu0 %v1069_v10  ;;  %v144_v40 = vld [vmem:[#allocation2 + $0x298] sm:$0xff]  ;;  %v47_v41 = vld [vmem:[%s1477_s0] sm:$0xff]  ;;  %v1113_v42 = vpack.c.bf16 %v126_v38, %v125_v37  ;;  %v49_v43 = vld [vmem:[%s1477_s0 + $0x10] sm:$0xff] }
  0x2c   :  { %1072 = vmatprep.subr.bf16.mxu0 %v1071_v14  ;;  %v1115_v44 = vpack.c.bf16 %v144_v40, %v143_v39  ;;  %v127_v45 = vld [vmem:[#allocation2 + $0x210] sm:$0xff]  ;;  %v128_v46 = vld [vmem:[#allocation2 + $0x218] sm:$0xff]  ;;  %v145_v47 = vld [vmem:[#allocation2 + $0x2a0] sm:$0xff] }
  0x2d   :  { %1102 = vmatpush3.bf16.msra.mxu1 %v1101_v13  ;;  %v146_v48 = vld [vmem:[#allocation2 + $0x2a8] sm:$0xff]  ;;  %v55_v49 = vld [vmem:[%s1477_s0 + $0x40] sm:$0xff]  ;;  %v57_v51 = vld [vmem:[%s1477_s0 + $0x50] sm:$0xff]  ;;  %v1117_v53 = vpack.c.bf16 %v128_v46, %v127_v45 }
  0x2e   :  { %1104 = vmatprep.subr.bf16.mxu1 %v1103_v18  ;;  %v157_v50 = vld [vmem:[#allocation2 + $0x300] sm:$0xff]  ;;  %v158_v52 = vld [vmem:[#allocation2 + $0x308] sm:$0xff]  ;;  %v54_v54 = vld [vmem:[%s1477_s0 + $0x38] sm:$0xff]  ;;  %v1119_v56 = vpack.c.bf16 %v146_v48, %v145_v47 }
  0x2f   :  { %1074 = vmatpush3.bf16.msra.mxu0 %v1073_v24  ;;  %v1143_v55 = vpack.c.bf16 %v158_v52, %v157_v50  ;;  %v129_v57 = vld [vmem:[#allocation2 + $0x220] sm:$0xff]  ;;  %v130_v58 = vld [vmem:[#allocation2 + $0x228] sm:$0xff]  ;;  %v147_v60 = vld [vmem:[#allocation2 + $0x2b0] sm:$0xff] }
  0x30   :  { %1076 = vmatprep.subr.bf16.mxu0 %v1075_v26  ;;  %v56_v59 = vld [vmem:[%s1477_s0 + $0x48] sm:$0xff]  ;;  %v148_v61 = vld [vmem:[#allocation2 + $0x2b8] sm:$0xff]  ;;  %v53_v63 = vld [vmem:[%s1477_s0 + $0x30] sm:$0xff]  ;;  %v1121_v0 = vpack.c.bf16 %v130_v58, %v129_v57 }
  0x31   :  { %1106 = vmatpush3.bf16.msra.mxu1 %v1105_v25  ;;  %v52_v62 = vld [vmem:[%s1477_s0 + $0x28] sm:$0xff]  ;;  %v1123_v1 = vpack.c.bf16 %v148_v61, %v147_v60  ;;  %v131_v2 = vld [vmem:[#allocation2 + $0x230] sm:$0xff]  ;;  %v132_v3 = vld [vmem:[#allocation2 + $0x238] sm:$0xff] }
  0x32   :  { %1108 = vmatprep.subr.bf16.mxu1 %v1107_v30  ;;  %v60_v4 = vld [vmem:[%s1477_s0 + $0x68] sm:$0xff]  ;;  %v149_v5 = vld [vmem:[#allocation2 + $0x2c0] sm:$0xff]  ;;  %v1125_v7 = vpack.c.bf16 %v132_v3, %v131_v2  ;;  %v151_v11 = vld [vmem:[#allocation2 + $0x2d0] sm:$0xff] }
  0x33   :  { %1078 = vmatpush3.bf16.msra.mxu0 %v1077_v34  ;;  %v150_v6 = vld [vmem:[#allocation2 + $0x2c8] sm:$0xff]  ;;  %v133_v9 = vld [vmem:[#allocation2 + $0x240] sm:$0xff]  ;;  %v152_v12 = vld [vmem:[#allocation2 + $0x2d8] sm:$0xff] }
  0x34   :  { %1112 = vmatprep.subr.bf16.mxu0 %v1111_v36  ;;  %v1127_v8 = vpack.c.bf16 %v150_v6, %v149_v5  ;;  %v134_v10 = vld [vmem:[#allocation2 + $0x248] sm:$0xff]  ;;  %v1131_v14 = vpack.c.bf16 %v152_v12, %v151_v11  ;;  %v135_v15 = vld [vmem:[#allocation2 + $0x250] sm:$0xff]  ;;  %v136_v16 = vld [vmem:[#allocation2 + $0x258] sm:$0xff] }
  0x35   :  { %1110 = vmatpush3.bf16.msra.mxu1 %v1109_v35  ;;  %v1129_v13 = vpack.c.bf16 %v134_v10, %v133_v9  ;;  %v153_v17 = vld [vmem:[#allocation2 + $0x2e0] sm:$0xff]  ;;  %v154_v18 = vld [vmem:[#allocation2 + $0x2e8] sm:$0xff]  ;;  %v1133_v19 = vpack.c.bf16 %v136_v16, %v135_v15  ;;  %v155_v23 = vld [vmem:[#allocation2 + $0x2f0] sm:$0xff] }
  0x36   :  { %238 = vmatmul.mubr.f32.vlgmr.msra.gmra.mrb[0].mxu0 %v47_v41  ;;  %1144 = vmatprep.subr.bf16.mxu1 %v1143_v55  ;;  %v1135_v20 = vpack.c.bf16 %v154_v18, %v153_v17  ;;  %v137_v21 = vld [vmem:[#allocation2 + $0x260] sm:$0xff]  ;;  %v138_v22 = vld [vmem:[#allocation2 + $0x268] sm:$0xff]  ;;  %v156_v24 = vld [vmem:[#allocation2 + $0x2f8] sm:$0xff] }
  0x37   :  { %1114 = vmatpush3.bf16.msra.mxu0 %v1113_v42  ;;  %242 = vmatprep.mubr.f32.mxu0 %v55_v49  ;;  %v1137_v25 = vpack.c.bf16 %v138_v22, %v137_v21  ;;  %v1139_v26 = vpack.c.bf16 %v156_v24, %v155_v23  ;;  %v139_v27 = vld [vmem:[#allocation2 + $0x270] sm:$0xff]  ;;  %v140_v28 = vld [vmem:[#allocation2 + $0x278] sm:$0xff]  ;;  %v51_v30 = vld [vmem:[%s1477_s0 + $0x20] sm:$0xff] }
  0x38   :  { %313 = vmatmul.mubr.f32.vlgmr.msra.gmra.mrb[0].mxu1 %v49_v43  ;;  %1116 = vmatprep.subr.bf16.mxu0 %v1115_v44  ;;  %v1141_v29 = vpack.c.bf16 %v140_v28, %v139_v27  ;;  %v59_v31 = vld [vmem:[%s1477_s0 + $0x60] sm:$0xff]  ;;  %v58_v32 = vld [vmem:[%s1477_s0 + $0x58] sm:$0xff]  ;;  %v476_v34 = vld [vmem:[%s1480_s3 + $0x8] sm:$0xff] }
  0x39   :  { %317 = vmatprep.mubr.f32.mxu1 %v57_v51  ;;  %1146 = vmatpush3.bf16.msra.mxu1 %v1143_v55  ;;  %v475_v33 = vld [vmem:[%s1480_s3] sm:$0xff]  ;;  %v477_v35 = vld [vmem:[%s1480_s3 + $0x10] sm:$0xff]  ;;  %v478_v37 = vld [vmem:[%s1480_s3 + $0x18] sm:$0xff] }
  0x3a   :  { %243 = vmatmul.mubr.f32.gmra.mrb[2].mxu0 %v54_v54  ;;  %v1147_v36 = vpack.c.bf16 %v476_v34, %v475_v33  ;;  %v1151_v38 = vpack.c.bf16 %v478_v37, %v477_v35  ;;  %v479_v39 = vld [vmem:[%s1480_s3 + $0x20] sm:$0xff]  ;;  %v480_v40 = vld [vmem:[%s1480_s3 + $0x28] sm:$0xff]  ;;  %v481_v42 = vld [vmem:[%s1480_s3 + $0x30] sm:$0xff] }
  0x3b   :  { %1118 = vmatpush3.bf16.msra.mxu0 %v1117_v53  ;;  %387 = vmatprep.mubr.f32.mxu0 %v52_v62  ;;  %v1155_v41 = vpack.c.bf16 %v480_v40, %v479_v39  ;;  %v482_v43 = vld [vmem:[%s1480_s3 + $0x38] sm:$0xff]  ;;  %v483_v45 = vld [vmem:[%s1480_s3 + $0x40] sm:$0xff]  ;;  %v484_v46 = vld [vmem:[%s1480_s3 + $0x48] sm:$0xff] }
  0x3c   :  { %318 = vmatmul.mubr.f32.gmra.mrb[2].mxu1 %v56_v59  ;;  %1120 = vmatprep.subr.bf16.mxu0 %v1119_v56  ;;  %v1159_v44 = vpack.c.bf16 %v482_v43, %v481_v42  ;;  %v1163_v47 = vpack.c.bf16 %v484_v46, %v483_v45  ;;  %v485_v48 = vld [vmem:[%s1480_s3 + $0x50] sm:$0xff]  ;;  %v486_v49 = vld [vmem:[%s1480_s3 + $0x58] sm:$0xff]  ;;  %v487_v51 = vld [vmem:[%s1480_s3 + $0x60] sm:$0xff] }
  0x3d   :  { %983 = vmatprep.mubr.msk.f32.mxu1 %vm166_vm0, %v53_v63  ;;  %1148 = vmatprep.subr.bf16.mxu1 %v1147_v36  ;;  %v1167_v50 = vpack.c.bf16 %v486_v49, %v485_v48  ;;  %v488_v52 = vld [vmem:[%s1480_s3 + $0x68] sm:$0xff]  ;;  %v489_v54 = vld [vmem:[%s1480_s3 + $0x70] sm:$0xff]  ;;  %v490_v55 = vld [vmem:[%s1480_s3 + $0x78] sm:$0xff] }
  0x3e   :  { %v1171_v53 = vpack.c.bf16 %v488_v52, %v487_v51  ;;  %v1175_v56 = vpack.c.bf16 %v490_v55, %v489_v54  ;;  %v575_v57 = vld [vmem:[%s1482_s5] sm:$0xff]  ;;  %v576_v58 = vld [vmem:[%s1482_s5 + $0x8] sm:$0xff]  ;;  %v577_v59 = vld [vmem:[%s1482_s5 + $0x10] sm:$0xff] }
  0x3f   :  { %1122 = vmatpush3.bf16.msra.mxu0 %v1121_v0  ;;  %v1179_v60 = vpack.c.bf16 %v576_v58, %v575_v57  ;;  %v578_v61 = vld [vmem:[%s1482_s5 + $0x18] sm:$0xff]  ;;  %v817_v0 = vld [vmem:[%s1479_s2] ss:$0 sm:$0xff]  ;;  %v581_v33 = vld [vmem:[%s1482_s5 + $0x30] sm:$0x3] }
  0x40   :  { %984 = vmatmul.mubr.msk.f32.vlgmr.msra.gmra.mrb[4].mxu1 %vm166_vm0, %v60_v4  ;;  %1124 = vmatprep.subr.bf16.mxu0 %v1123_v1  ;;  %v1183_v62 = vpack.c.bf16 %v578_v61, %v577_v59  ;;  %v820_v34 = vld [vmem:[%s1481_s4] ss:$0 sm:$0xff]  ;;  %v678_v42 = vld [vmem:[%s1484_s7 + $0x8] sm:$0xff] }
  0x41   :  { %1150 = vmatpush3.bf16.msra.mxu1 %v1147_v36  ;;  %v821_v45 = vld [vmem:[%s1483_s6] ss:$0 sm:$0xff]  ;;  %s1258_s6 = smov [#allocation5]  }
  0x42   :  { %1152 = vmatprep.subr.bf16.mxu1 %v1151_v38  ;;  %v825_v52 = vld [vmem:[%s1485_s8] ss:$0 sm:$0xff] }
  0x43   :  { %1126 = vmatpush3.bf16.msra.mxu0 %v1125_v7 }
  0x44   :  { %1128 = vmatprep.subr.bf16.mxu0 %v1127_v8 }
  0x45   :  { %1154 = vmatpush3.bf16.msra.mxu1 %v1151_v38 }
  0x46   :  { %1156 = vmatprep.subr.bf16.mxu1 %v1155_v41 }
  0x47   :  { %1130 = vmatpush3.bf16.msra.mxu0 %v1129_v13 }
  0x48   :  { %1132 = vmatprep.subr.bf16.mxu0 %v1131_v14 }
  0x49   :  { %1158 = vmatpush3.bf16.msra.mxu1 %v1155_v41  ;;  %v677_v41 = vld [vmem:[%s1484_s7] sm:$0xff] }
  0x4a   :  { %1160 = vmatprep.subr.bf16.mxu1 %v1159_v44  ;;  %v1191_v43 = vpack.c.bf16 %v678_v42, %v677_v41 }
  0x4b   :  { %1134 = vmatpush3.bf16.msra.mxu0 %v1133_v19 }
  0x4c   :  { %1136 = vmatprep.subr.bf16.mxu0 %v1135_v20 }
  0x4d   :  { %1162 = vmatpush3.bf16.msra.mxu1 %v1159_v44  ;;  %v679_v44 = vld [vmem:[%s1484_s7 + $0x10] sm:$0xf]  ;;  %s805_s7 = sshll.u32 %s1258_s6, 4  ;;  %s806_s7 = int_to_ptr.vmem [resolvable:$true] %s805_s7 }
  0x4e   :  { %1164 = vmatprep.subr.bf16.mxu1 %v1163_v47  ;;  %s1229_s8 = scalar_lea.vmem %s806_s7, 256  ;;  %p1234_p9 = scmp.lt.s32.totalorder %s806_s7, %s806_s7 }
  0x4f   :  { %1138 = vmatpush3.bf16.msra.mxu0 %v1137_v25  ;;  %p1230_p8 = scmp.ne.s32.totalorder %s806_s7, %s1229_s8  ;;  %p1235_p10 = scmp.lt.s32.totalorder %s1229_s8, %s1229_s8 }
  0x50   :  { %1140 = vmatprep.subr.bf16.mxu0 %v1139_v26 }
  0x51   :  { %1166 = vmatpush3.bf16.msra.mxu1 %v1163_v47  ;;  %p1236_p11 = por %p1235_p10, %p1234_p9 }
  0x52   :  { %1168 = vmatprep.subr.bf16.mxu1 %v1167_v50 }
  0x53   :  { %1142 = vmatpush3.bf16.msra.mxu0 %v1141_v29  ;;  %p1237_p12 = pnand %p1236_p11, %p1230_p8 }
  0x54   :  { %1180 = vmatprep.subr.bf16.mxu0 %v1179_v60 }
  0x55   :  { %1170 = vmatpush3.bf16.msra.mxu1 %v1167_v50 }
  0x56   :  { %388 = vmatmul.mubr.f32.vlgmr.msra.gmra.mrb[4].mxu0 %v51_v30  ;;  %1172 = vmatprep.subr.bf16.mxu1 %v1171_v53  ;;  %v579_v30 = vld [vmem:[%s1482_s5 + $0x20] sm:$0xff] }
  0x57   :  { %392 = vmatprep.mubr.f32.mxu0 %v59_v31  ;;  %1182 = vmatpush3.bf16.msra.mxu0 %v1179_v60  ;;  %v580_v31 = vld [vmem:[%s1482_s5 + $0x28] sm:$0xff] }
  0x58   :  { %1184 = vmatprep.subr.bf16.mxu0 %v1183_v62 }
  0x59   :  { %1174 = vmatpush3.bf16.msra.mxu1 %v1171_v53 }
  0x5a   :  { %393 = vmatmul.mubr.f32.gmra.mrb[6].mxu0 %v58_v32  ;;  %1176 = vmatprep.subr.bf16.mxu1 %v1175_v56  ;;  %v1187_v32 = vpack.c.bf16 %v580_v31, %v579_v30 }
  0x5b   :  { %1186 = vmatpush3.bf16.msra.mxu0 %v1183_v62 }
  0x5c   :  { %1188 = vmatprep.subr.bf16.mxu0 %v1187_v32 }
  0x5d   :  { %1178 = vmatpush3.bf16.msra.mxu1 %v1175_v56 }
  0x5e   :  { %1192 = vmatprep.subr.bf16.mxu1 %v1191_v43 }
  0x5f   :  { %1190 = vmatpush3.bf16.msra.mxu0 %v1187_v32 }
  0x60   :  { %1033 = vmatprep.subr.msk.mxu0 %vm596_vm1, %v581_v33 }
  0x63   :  { %1034 = vmatpush3.msk.msra.mxu0 %vm596_vm1, %v581_v33 }
 0x109   :  { %v861_v63 = vpop.f32.mrb[0].mxu0 }
 0x10a   :  { %v862_v1 = vpop.f32.mrb[1].mxu0 }
 0x10b   :  { %v899_v2 = vpop.f32.mrb[0].mxu1  ;;  %v863_v3 = vadd.f32 %v862_v1, %v861_v63 }
 0x10c   :  { %v900_v4 = vpop.f32.mrb[1].mxu1 }
 0x10d   :  { %v901_v5 = vadd.f32 %v900_v4, %v899_v2  ;;  %v240_v6 = vadd.f32 %v863_v3, %v817_v0  ;;  %v864_v7 = vpop.f32.mrb[2].mxu0 }
 0x10e   :  { %v865_v8 = vpop.f32.mrb[3].mxu0 }
 0x10f   :  { %v902_v9 = vpop.f32.mrb[2].mxu1  ;;  %v315_v10 = vadd.f32 %v901_v5, %v240_v6  ;;  %v866_v11 = vadd.f32 %v865_v8, %v864_v7 }
 0x110   :  { %v903_v12 = vpop.f32.mrb[3].mxu1 }
 0x111   :  { %v904_v13 = vadd.f32 %v903_v12, %v902_v9  ;;  %v245_v14 = vadd.f32 %v866_v11, %v817_v0 }
 0x113   :  { %v985_v15 = vpop.f32.mrb[4].mxu1  ;;  %v320_v16 = vadd.f32 %v904_v13, %v245_v14 }
 0x114   :  { %v464_v17 = vpop.f32.mrb[5].mxu1 }
 0x129   :  { %v937_v18 = vpop.f32.mrb[4].mxu0 }
 0x12a   :  { %v938_v19 = vpop.f32.mrb[5].mxu0 }
 0x12b   :  { %v939_v20 = vadd.f32 %v938_v19, %v937_v18 }
 0x12d   :  { %v940_v21 = vpop.f32.mrb[6].mxu0  ;;  %v390_v22 = vadd.f32 %v939_v20, %v315_v10 }
 0x12e   :  { %v941_v23 = vpop.f32.mrb[7].mxu0 }
 0x12f   :  { %v942_v24 = vadd.f32 %v941_v23, %v940_v21  ;;  %v465_v25 = vadd.f32 %v464_v17, %v390_v22 }
 0x131   :  { %v395_v26 = vadd.f32 %v942_v24, %v320_v16  ;;  %v473_v27 = vmax.f32 %v465_v25, 0.0 }
 0x133   :  { %v470_v28 = vadd.f32 %v985_v15, %v395_v26  ;;  %1018 = vmatprep.mubr.f32.mxu1 %v473_v27 }
 0x135   :  { %v474_v29 = vmax.f32 %v470_v28, 0.0 }
 0x137   :  { %1019 = vmatmul.mubr.f32.vlgmr.msra.gmra.mrb[6].mxu1 %v474_v29 }
 0x138   :  { %1194 = vmatpush3.bf16.msra.mxu1 %v1191_v43 }
 0x139   :  { %1042 = vmatprep.subr.msk.mxu1 %vm694_vm3, %v679_v44 }
 0x13c   :  { %1043 = vmatpush3.msk.msra.mxu1 %vm694_vm3, %v679_v44 }
 0x20a   :  { %v1020_v35 = vpop.f32.mrb[6].mxu1 }
 0x20b   :  { %v570_v36 = vadd.f32 %v1020_v35, %v820_v34  ;;  %v564_v37 = vpop.f32.mrb[7].mxu1 }
 0x20c   :  { %v565_v38 = vadd.f32 %v820_v34, %v564_v37 }
 0x20d   :  { %v574_v40 = vmax.f32 %v570_v36, 0.0 }
 0x20e   :  { %v573_v39 = vmax.f32 %v565_v38, 0.0 }
 0x210   :  { %1035 = vmatprep.mubr.msk.f32.mxu0 %vm589_vm2, %v573_v39 }
 0x211   :  { %1036 = vmatmul.mubr.msk.f32.vlgmr.msra.gmra.mrb[8].mxu0 %vm589_vm2, %v574_v40 }
 0x2e4   :  { %v1037_v46 = vpop.f32.mrb[8].mxu0 }
 0x2e5   :  { %v672_v47 = vadd.f32 %v1037_v46, %v821_v45  ;;  %v666_v48 = vpop.f32.mrb[9].mxu0 }
 0x2e6   :  { %v667_v49 = vadd.f32 %v821_v45, %v666_v48 }
 0x2e7   :  { %v676_v51 = vmax.f32 %v672_v47, 0.0 }
 0x2e8   :  { %v675_v50 = vmax.f32 %v667_v49, 0.0 }
 0x2ea   :  { %1044 = vmatprep.mubr.msk.f32.mxu1 %vm687_vm4, %v675_v50 }
 0x2eb   :  { %1045 = vmatmul.mubr.msk.f32.vlgmr.msra.gmra.mrb[8].mxu1 %vm687_vm4, %v676_v51 }
 0x3be   :  { %v1046_v53 = vpop.f32.mrb[8].mxu1 }
 0x3bf   :  { %v764_v54 = vpop.f32.mrb[9].mxu1  ;;  %v770_v56 = vadd.f32 %v1046_v53, %v825_v52 }
 0x3c0   :  { %v765_v55 = vadd.f32 %v825_v52, %v764_v54 }
 0x3c1   :  { %v777_v58 = vsel %vm773_vm5, %v770_v56, -inf }
 0x3c2   :  { %v774_v57 = vsel %vm773_vm5, %v765_v55, -inf }
 0x3c3   :  { %775 = vmax.xlane.f32.xlu0 %v774_v57 }
 0x3c7   :  { %778 = vmax.xlane.f32.xlu0 %v777_v58 }
 0x450   :  { %v776_v59 = vpop.xlane.xlu0 %775 }
 0x451   :  { %v780_v60 = vsub.f32 %v765_v55, %v776_v59 }
 0x453   :  { %v782_v61 = vmul.f32 1.442695, %v780_v60 }
 0x454   :  { %v779_v62 = vpop.xlane.xlu0 %778 }
 0x455   :  { %1199 = vpow2.f32 %v782_v61  ;;  %v781_v63 = vsub.f32 %v770_v56, %v779_v62 }
 0x457   :  { %v784_v0 = vmul.f32 1.442695, %v781_v63 }
 0x459   :  { %1201 = vpow2.f32 %v784_v0 }
 0x45f   :  { %v1200_v1 = vpop.eup %1199 }
 0x460   :  { %v786_v2 = vsel %vm773_vm5, %v1200_v1, 0.0 }
 0x461   :  { %787 = vadd.xlane.f32.xlu1 %v786_v2 }
 0x463   :  { %v1202_v3 = vpop.eup %1201 }
 0x464   :  { %v789_v4 = vsel %vm773_vm5, %v1202_v3, 0.0 }
 0x465   :  { %790 = vadd.xlane.f32.xlu1 %v789_v4 }
 0x4ee   :  { %v788_v5 = vpop.xlane.xlu1 %787 }
 0x4ef   :  { %1203 = vlog2.f32 %v788_v5 }
 0x4f2   :  { %v791_v6 = vpop.xlane.xlu1 %790 }
 0x4f3   :  { %1205 = vlog2.f32 %v791_v6 }
 0x4f9   :  { %v1204_v7 = vpop.eup %1203 }
 0x4fa   :  { %v793_v8 = vmul.f32 0.6931472, %v1204_v7 }
 0x4fc   :  { %v796_v9 = vsub.f32 %v780_v60, %v793_v8 }
 0x4fd   :  { %v1206_v10 = vpop.eup %1205 }
 0x4fe   :  { %798 = vst.msk [vmem:[#allocation5] sm:$0xff] %vm773_vm5, %v796_v9  ;;  %v795_v11 = vmul.f32 0.6931472, %v1206_v10 }
 0x500   :  { %v797_v12 = vsub.f32 %v781_v63, %v795_v11 }
 0x502   :  { %799 = vst.msk [vmem:[#allocation5 + $0x8] sm:$0xff] %vm773_vm5, %v797_v12 }
 0x503   :  { %1240 = shalt.err (!%p1237_p12)
}
 0x504   :  { %s1241_s25 = scalar_lea.hbm %s1486_s9, 256 }
 0x505   :  { %p1242_p13 = scmp.ne.s32.totalorder %s1486_s9, %s1241_s25  ;;  %p1245_p0 = scmp.lt.u32.totalorder %s1241_s25, %s1486_s9 }
 0x507   :  { %p1247_p1 = pnand %p1245_p0, %p1242_p13 }
 0x509   :  { %1250 = shalt.err (!%p1247_p1)
}
 0x50a   :  { %811 = dma.vmem_to_hbm [thread:$0]  %s806_s7, 256, %s1486_s9, [#allocation4], %s1256_s19, %s1256_s19, %s1257_s20  }
 0x50b   :  { %1253 = dma.done.wait [#allocation4], 256  }
 0x50c   :  { %1254 = vsyncadd [#allocation4], 4294967040 }
 0x50d   :  { %815 = vsyncpa [#allocation3], 1 }
 0x50e   :  { %816 = vsyncpa [#allocation4], 1 }

</bundles_post_ra>
